<compile_context>
chip_gen: v6e
topology: v6e:2x2x1
jax: 0.10.0
libtpu: 0.0.40
codegen_flags: <defaults>
</compile_context>

<pallas_src>
import functools

import jax
import jax.numpy as jnp
from jax.experimental import pallas as pl
from jax.experimental.pallas import tpu as pltpu


# ---------------------------------------------------------------------------
# Parameter preparation (run ONCE per parameter set; cache and reuse result).
# ---------------------------------------------------------------------------
def prepare_multi_model_params(w1, b1, w2, b2, *, compute_dtype=jnp.bfloat16):
    """Cast / reshape cohort parameters once.

    w1: (N, D, H)   b1: (N, H) or (N, 1, H)
    w2: (N, H, C)   b2: (N, C) or (N, 1, C)

    MXU operands (w1, w2) are stored in `compute_dtype` (bf16 by default); biases stay in f32
    because they are added to the f32 accumulator on the VPU.
    """
    n_model = w1.shape[0]
    w1c = jnp.asarray(w1, dtype=compute_dtype)
    w2c = jnp.asarray(w2, dtype=compute_dtype)
    b1c = jnp.asarray(b1, dtype=jnp.float32).reshape(n_model, 1, w1.shape[-1])
    b2c = jnp.asarray(b2, dtype=jnp.float32).reshape(n_model, 1, w2.shape[-1])
    return (w1c, b1c, w2c, b2c)


# ---------------------------------------------------------------------------
# Kernels
# ---------------------------------------------------------------------------
def _make_fused_kernel(n_model):
    """Single-step kernel: statically unrolled per-cohort MLPs, all refs whole in VMEM."""
    def kernel(x_ref, w1_ref, b1_ref, w2_ref, b2_ref, o_ref):
        x = x_ref[...].astype(w1_ref.dtype)              # f32 -> bf16 once, on the VPU
        for m in range(n_model):                         # small static unroll
            h = jnp.dot(x, w1_ref[m], preferred_element_type=jnp.float32)
            h = jnp.maximum(h + b1_ref[m], 0.0)          # bias + ReLU in f32 (v5e-safe)
            y = jnp.dot(h.astype(w2_ref.dtype), w2_ref[m],
                        preferred_element_type=jnp.float32)
            o_ref[m] = (y + b2_ref[m]).astype(o_ref.dtype)
    return kernel


def _tiled_kernel(x_ref, w1_ref, b1_ref, w2_ref, b2_ref, o_ref, acc_ref):
    """Grid = (model, B-tile, K-tile); f32 accumulator persists across the K axis."""
    k = pl.program_id(2)

    @pl.when(k == 0)
    def _init():
        acc_ref[...] = jnp.zeros_like(acc_ref)

    acc_ref[...] += jnp.dot(x_ref[...].astype(w1_ref.dtype), w1_ref[0],
                            preferred_element_type=jnp.float32)

    @pl.when(k == pl.num_programs(2) - 1)
    def _finalize():
        h = jnp.maximum(acc_ref[...] + b1_ref[0], 0.0)   # bias + ReLU in f32
        y = jnp.dot(h.astype(w2_ref.dtype), w2_ref[0],
                    preferred_element_type=jnp.float32)
        o_ref[0] = (y + b2_ref[0]).astype(o_ref.dtype)


# ---------------------------------------------------------------------------
# Forward wrappers
# ---------------------------------------------------------------------------
def _cost_estimate(B, D, H, C, N, arrays, out_bytes):
    flops = 2 * N * B * (D * H + H * C)
    bytes_accessed = sum(int(a.size) * a.dtype.itemsize for a in arrays) + out_bytes
    return pl.CostEstimate(flops=flops, transcendentals=0, bytes_accessed=bytes_accessed)


def _fused_forward(x, params):
    """Small path: everything resident in VMEM, a single grid step."""
    w1, b1, w2, b2 = params
    N, D, H = w1.shape
    C = w2.shape[-1]
    B = x.shape[0]
    cost = _cost_estimate(B, D, H, C, N, (x, w1, b1, w2, b2),
                          N * B * C * x.dtype.itemsize)
    return pl.pallas_call(
        _make_fused_kernel(N),
        out_shape=jax.ShapeDtypeStruct((N, B, C), x.dtype),
        cost_estimate=cost,
    )(x, w1, b1, w2, b2)


def _pick_tile(total, candidates):
    for c in candidates:
        if c < total and total % c == 0:
            return c
    return total


def _tiled_forward(x, params, *, tb=None, td=None):
    """Tiled path: grid over (model, B-tiles, K-tiles) with an f32 accumulator."""
    w1, b1, w2, b2 = params
    N, D, H = w1.shape
    C = w2.shape[-1]
    B = x.shape[0]

    if tb is None:
        tb = B if B <= 512 else _pick_tile(B, (512, 256, 128, 64, 32, 16, 8))
    if td is None:
        td = D if D <= 1024 else _pick_tile(D, (1024, 512, 256, 128))
    nb, nk = B // tb, D // td
    assert tb * nb == B and td * nk == D, "tile sizes must divide B and D evenly"
    # TODO(synk): H and C are not tiled -- each cohort's (td, H) and (H, C) weight blocks must
    #             fit VMEM; add an output-N tile axis for very wide cohort layers.

    cost = _cost_estimate(B, D, H, C, N, (x, w1, b1, w2, b2),
                          N * B * C * x.dtype.itemsize)
    return pl.pallas_call(
        _tiled_kernel,
        out_shape=jax.ShapeDtypeStruct((N, B, C), x.dtype),
        grid_spec=pltpu.PrefetchScalarGridSpec(
            num_scalar_prefetch=0,
            grid=(N, nb, nk),
            in_specs=[
                pl.BlockSpec((tb, td), lambda m, b, k: (b, k)),      # x tile
                pl.BlockSpec((1, td, H), lambda m, b, k: (m, k, 0)),  # w1[m] K-slab
                pl.BlockSpec((1, 1, H), lambda m, b, k: (m, 0, 0)),   # b1[m]
                pl.BlockSpec((1, H, C), lambda m, b, k: (m, 0, 0)),   # w2[m]
                pl.BlockSpec((1, 1, C), lambda m, b, k: (m, 0, 0)),   # b2[m]
            ],
            out_specs=pl.BlockSpec((1, tb, C), lambda m, b, k: (m, b, 0)),
            scratch_shapes=[pltpu.VMEM((tb, H), jnp.float32)],
        ),
        compiler_params=pltpu.CompilerParams(
            dimension_semantics=("parallel", "parallel", "arbitrary"),
            vmem_limit_bytes=48 * 1024 * 1024,   # fits v7x's 64 MiB physical VMEM
        ),
        cost_estimate=cost,
    )(x, w1, b1, w2, b2)


_SMALL_PATH_VMEM_BYTES = 8 * 1024 * 1024   # conservative across v5e / v6e / v7x


def multi_model_forward(x, params):
    """Run every cohort model on the same input x.

    Returns a stacked (N, B, C) array with out[m] == model_m(x); the PyTorch list output is
    simply `list(out)`.  Call `prepare_multi_model_params` once and reuse `params`.
    """
    w1, b1, w2, b2 = params
    N, D, H = w1.shape
    C = w2.shape[-1]
    B = x.shape[0]
    footprint = (x.size * x.dtype.itemsize
                 + w1.size * w1.dtype.itemsize + b1.size * b1.dtype.itemsize
                 + w2.size * w2.dtype.itemsize + b2.size * b2.dtype.itemsize
                 + N * B * C * x.dtype.itemsize    # output
                 + B * H * 4)                      # live f32 hidden tile
    if footprint <= _SMALL_PATH_VMEM_BYTES:
        return _fused_forward(x, params)
    return _tiled_forward(x, params)


# ---------------------------------------------------------------------------
# Plain-JAX reference (mimics the kernel's bf16 cast points; biases stay f32)
# ---------------------------------------------------------------------------
def _reference_forward(x, w1, b1, w2, b2, *, compute_dtype=jnp.bfloat16):
    n_model = w1.shape[0]
    xb = x.astype(compute_dtype)
    outs = []
    for m in range(n_model):
        h = jnp.dot(xb, w1[m].astype(compute_dtype),
                    preferred_element_type=jnp.float32)
        h = jnp.maximum(h + b1[m].reshape(1, -1).astype(jnp.float32), 0.0)
        y = jnp.dot(h.astype(compute_dtype), w2[m].astype(compute_dtype),
                    preferred_element_type=jnp.float32)
        outs.append((y + b2[m].reshape(1, -1).astype(jnp.float32)).astype(x.dtype))
    return jnp.stack(outs)


if __name__ == "__main__":
    # ---- config 1: tiny shapes (exercises the single-step small path) -------
    N1, B1, D1, H1, C1 = 3, 8, 32, 32, 16
    k1 = jax.random.split(jax.random.PRNGKey(0), 5)
    x1 = jax.random.normal(k1[0], (B1, D1), jnp.float32)
    w1a = jax.random.normal(k1[1], (N1, D1, H1), jnp.float32) * 0.1
    b1a = jax.random.normal(k1[2], (N1, 1, H1), jnp.float32) * 0.1
    w2a = jax.random.normal(k1[3], (N1, H1, C1), jnp.float32) * 0.1
    b2a = jax.random.normal(k1[4], (N1, 1, C1), jnp.float32) * 0.1

    params1 = prepare_multi_model_params(w1a, b1a, w2a, b2a)   # cast ONCE, reuse
    fwd = jax.jit(multi_model_forward)

    out1 = jax.block_until_ready(fwd(x1, params1))
    assert out1.shape == (N1, B1, C1)
    ref1 = _reference_forward(x1, w1a, b1a, w2a, b2a)
    err1 = float(jnp.max(jnp.abs(out1 - ref1)))
    assert jnp.allclose(out1, ref1, atol=3e-2, rtol=3e-2), err1

    # Force the tiled path on the same tiny problem (grid = (N, 1, 1)).
    out1t = jax.block_until_ready(jax.jit(_tiled_forward)(x1, params1))
    err1t = float(jnp.max(jnp.abs(out1t - ref1)))
    assert jnp.allclose(out1t, ref1, atol=3e-2, rtol=3e-2), err1t

    # ---- config 2: exercise real B / K tiling in the tiled path -------------
    N2, B2, D2, H2, C2 = 2, 128, 256, 128, 128
    k2 = jax.random.split(jax.random.PRNGKey(1), 5)
    x2 = jax.random.normal(k2[0], (B2, D2), jnp.float32)
    w1b = jax.random.normal(k2[1], (N2, D2, H2), jnp.float32) * 0.05
    b1b = jax.random.normal(k2[2], (N2, 1, H2), jnp.float32) * 0.1
    w2b = jax.random.normal(k2[3], (N2, H2, C2), jnp.float32) * 0.05
    b2b = jax.random.normal(k2[4], (N2, 1, C2), jnp.float32) * 0.1

    params2 = prepare_multi_model_params(w1b, b1b, w2b, b2b)
    ref2 = _reference_forward(x2, w1b, b1b, w2b, b2b)

    out2 = jax.block_until_ready(fwd(x2, params2))             # dispatcher path
    err2 = float(jnp.max(jnp.abs(out2 - ref2)))
    assert jnp.allclose(out2, ref2, atol=3e-2, rtol=3e-2), err2

    tiled = jax.jit(functools.partial(_tiled_forward, tb=64, td=128))
    out2t = jax.block_until_ready(tiled(x2, params2))          # grid = (2, 2, 2)
    err2t = float(jnp.max(jnp.abs(out2t - ref2)))
    assert jnp.allclose(out2t, ref2, atol=3e-2, rtol=3e-2), err2t

    print("KERNEL_OK")
</pallas_src>

<mosaic_0001>
module attributes {stable_mosaic.version = 11 : i64} {
  func.func @kernel(%arg0: memref<8x32xf32, #tpu.memory_space<vmem>>, %arg1: memref<3x32x32xbf16, #tpu.memory_space<vmem>>, %arg2: memref<3x1x32xf32, #tpu.memory_space<vmem>>, %arg3: memref<3x32x16xbf16, #tpu.memory_space<vmem>>, %arg4: memref<3x1x16xf32, #tpu.memory_space<vmem>>, %arg5: memref<3x8x16xf32, #tpu.memory_space<vmem>>) attributes {dimension_semantics = [], scalar_prefetch = 0 : i64, scratch_operands = 0 : i64, tpu.core_type = #tpu.core_type<tc>} {
    %c0 = arith.constant 0 : index
    %c0_0 = arith.constant 0 : index
    %0 = vector.load %arg0[%c0, %c0_0] : memref<8x32xf32, #tpu.memory_space<vmem>>, vector<8x32xf32>
    %1 = arith.truncf %0 : vector<8x32xf32> to vector<8x32xbf16>
    %c0_1 = arith.constant 0 : index
    %c0_2 = arith.constant 0 : index
    %c0_3 = arith.constant 0 : index
    %2 = vector.load %arg1[%c0_1, %c0_2, %c0_3] : memref<3x32x32xbf16, #tpu.memory_space<vmem>>, vector<1x32x32xbf16>
    %3 = vector.shape_cast %2 : vector<1x32x32xbf16> to vector<32x32xbf16>
    %cst = arith.constant dense<0.000000e+00> : vector<8x32xf32>
    %4 = tpu.matmul %1, %3, %cst {dimension_numbers = #tpu.dot_dimension_numbers<[1], [0], [0], [1], [0, 0, 1, 1], [], []>} : vector<8x32xbf16>, vector<32x32xbf16>, vector<8x32xf32> -> vector<8x32xf32>
    %c0_4 = arith.constant 0 : index
    %c0_5 = arith.constant 0 : index
    %c0_6 = arith.constant 0 : index
    %5 = vector.load %arg2[%c0_4, %c0_5, %c0_6] : memref<3x1x32xf32, #tpu.memory_space<vmem>>, vector<1x1x32xf32>
    %6 = vector.shape_cast %5 : vector<1x1x32xf32> to vector<1x32xf32>
    %7 = vector.broadcast %6 : vector<1x32xf32> to vector<8x32xf32>
    %8 = arith.addf %4, %7 : vector<8x32xf32>
    %cst_7 = arith.constant 0.000000e+00 : f32
    %9 = vector.broadcast %cst_7 : f32 to vector<8x32xf32>
    %10 = arith.maximumf %8, %9 : vector<8x32xf32>
    %11 = arith.truncf %10 : vector<8x32xf32> to vector<8x32xbf16>
    %c0_8 = arith.constant 0 : index
    %c0_9 = arith.constant 0 : index
    %c0_10 = arith.constant 0 : index
    %12 = vector.load %arg3[%c0_8, %c0_9, %c0_10] : memref<3x32x16xbf16, #tpu.memory_space<vmem>>, vector<1x32x16xbf16>
    %13 = vector.shape_cast %12 : vector<1x32x16xbf16> to vector<32x16xbf16>
    %cst_11 = arith.constant dense<0.000000e+00> : vector<8x16xf32>
    %14 = tpu.matmul %11, %13, %cst_11 {dimension_numbers = #tpu.dot_dimension_numbers<[1], [0], [0], [1], [0, 0, 1, 1], [], []>} : vector<8x32xbf16>, vector<32x16xbf16>, vector<8x16xf32> -> vector<8x16xf32>
    %c0_12 = arith.constant 0 : index
    %c0_13 = arith.constant 0 : index
    %c0_14 = arith.constant 0 : index
    %15 = vector.load %arg4[%c0_12, %c0_13, %c0_14] : memref<3x1x16xf32, #tpu.memory_space<vmem>>, vector<1x1x16xf32>
    %16 = vector.shape_cast %15 : vector<1x1x16xf32> to vector<1x16xf32>
    %17 = vector.broadcast %16 : vector<1x16xf32> to vector<8x16xf32>
    %18 = arith.addf %14, %17 : vector<8x16xf32>
    %c0_15 = arith.constant 0 : index
    %c0_16 = arith.constant 0 : index
    %c0_17 = arith.constant 0 : index
    %19 = vector.load %arg5[%c0_15, %c0_16, %c0_17] : memref<3x8x16xf32, #tpu.memory_space<vmem>>, vector<1x8x16xf32>
    %20 = vector.shape_cast %19 : vector<1x8x16xf32> to vector<8x16xf32>
    %21 = vector.shape_cast %18 : vector<8x16xf32> to vector<1x8x16xf32>
    tpu.vector_store %arg5[%c0_15, %c0_16, %c0_17], %21 {strides = array<i32>} : memref<3x8x16xf32, #tpu.memory_space<vmem>>, vector<1x8x16xf32>,
    %c1 = arith.constant 1 : index
    %c0_18 = arith.constant 0 : index
    %c0_19 = arith.constant 0 : index
    %22 = vector.load %arg1[%c1, %c0_18, %c0_19] : memref<3x32x32xbf16, #tpu.memory_space<vmem>>, vector<1x32x32xbf16>
    %23 = vector.shape_cast %22 : vector<1x32x32xbf16> to vector<32x32xbf16>
    %cst_20 = arith.constant dense<0.000000e+00> : vector<8x32xf32>
    %24 = tpu.matmul %1, %23, %cst_20 {dimension_numbers = #tpu.dot_dimension_numbers<[1], [0], [0], [1], [0, 0, 1, 1], [], []>} : vector<8x32xbf16>, vector<32x32xbf16>, vector<8x32xf32> -> vector<8x32xf32>
    %c1_21 = arith.constant 1 : index
    %c0_22 = arith.constant 0 : index
    %c0_23 = arith.constant 0 : index
    %25 = vector.load %arg2[%c1_21, %c0_22, %c0_23] : memref<3x1x32xf32, #tpu.memory_space<vmem>>, vector<1x1x32xf32>
    %26 = vector.shape_cast %25 : vector<1x1x32xf32> to vector<1x32xf32>
    %27 = vector.broadcast %26 : vector<1x32xf32> to vector<8x32xf32>
    %28 = arith.addf %24, %27 : vector<8x32xf32>
    %cst_24 = arith.constant 0.000000e+00 : f32
    %29 = vector.broadcast %cst_24 : f32 to vector<8x32xf32>
    %30 = arith.maximumf %28, %29 : vector<8x32xf32>
    %31 = arith.truncf %30 : vector<8x32xf32> to vector<8x32xbf16>
    %c1_25 = arith.constant 1 : index
    %c0_26 = arith.constant 0 : index
    %c0_27 = arith.constant 0 : index
    %32 = vector.load %arg3[%c1_25, %c0_26, %c0_27] : memref<3x32x16xbf16, #tpu.memory_space<vmem>>, vector<1x32x16xbf16>
    %33 = vector.shape_cast %32 : vector<1x32x16xbf16> to vector<32x16xbf16>
    %cst_28 = arith.constant dense<0.000000e+00> : vector<8x16xf32>
    %34 = tpu.matmul %31, %33, %cst_28 {dimension_numbers = #tpu.dot_dimension_numbers<[1], [0], [0], [1], [0, 0, 1, 1], [], []>} : vector<8x32xbf16>, vector<32x16xbf16>, vector<8x16xf32> -> vector<8x16xf32>
    %c1_29 = arith.constant 1 : index
    %c0_30 = arith.constant 0 : index
    %c0_31 = arith.constant 0 : index
    %35 = vector.load %arg4[%c1_29, %c0_30, %c0_31] : memref<3x1x16xf32, #tpu.memory_space<vmem>>, vector<1x1x16xf32>
    %36 = vector.shape_cast %35 : vector<1x1x16xf32> to vector<1x16xf32>
    %37 = vector.broadcast %36 : vector<1x16xf32> to vector<8x16xf32>
    %38 = arith.addf %34, %37 : vector<8x16xf32>
    %c1_32 = arith.constant 1 : index
    %c0_33 = arith.constant 0 : index
    %c0_34 = arith.constant 0 : index
    %39 = vector.load %arg5[%c1_32, %c0_33, %c0_34] : memref<3x8x16xf32, #tpu.memory_space<vmem>>, vector<1x8x16xf32>
    %40 = vector.shape_cast %39 : vector<1x8x16xf32> to vector<8x16xf32>
    %41 = vector.shape_cast %38 : vector<8x16xf32> to vector<1x8x16xf32>
    tpu.vector_store %arg5[%c1_32, %c0_33, %c0_34], %41 {strides = array<i32>} : memref<3x8x16xf32, #tpu.memory_space<vmem>>, vector<1x8x16xf32>,
    %c2 = arith.constant 2 : index
    %c0_35 = arith.constant 0 : index
    %c0_36 = arith.constant 0 : index
    %42 = vector.load %arg1[%c2, %c0_35, %c0_36] : memref<3x32x32xbf16, #tpu.memory_space<vmem>>, vector<1x32x32xbf16>
    %43 = vector.shape_cast %42 : vector<1x32x32xbf16> to vector<32x32xbf16>
    %cst_37 = arith.constant dense<0.000000e+00> : vector<8x32xf32>
    %44 = tpu.matmul %1, %43, %cst_37 {dimension_numbers = #tpu.dot_dimension_numbers<[1], [0], [0], [1], [0, 0, 1, 1], [], []>} : vector<8x32xbf16>, vector<32x32xbf16>, vector<8x32xf32> -> vector<8x32xf32>
    %c2_38 = arith.constant 2 : index
    %c0_39 = arith.constant 0 : index
    %c0_40 = arith.constant 0 : index
    %45 = vector.load %arg2[%c2_38, %c0_39, %c0_40] : memref<3x1x32xf32, #tpu.memory_space<vmem>>, vector<1x1x32xf32>
    %46 = vector.shape_cast %45 : vector<1x1x32xf32> to vector<1x32xf32>
    %47 = vector.broadcast %46 : vector<1x32xf32> to vector<8x32xf32>
    %48 = arith.addf %44, %47 : vector<8x32xf32>
    %cst_41 = arith.constant 0.000000e+00 : f32
    %49 = vector.broadcast %cst_41 : f32 to vector<8x32xf32>
    %50 = arith.maximumf %48, %49 : vector<8x32xf32>
    %51 = arith.truncf %50 : vector<8x32xf32> to vector<8x32xbf16>
    %c2_42 = arith.constant 2 : index
    %c0_43 = arith.constant 0 : index
    %c0_44 = arith.constant 0 : index
    %52 = vector.load %arg3[%c2_42, %c0_43, %c0_44] : memref<3x32x16xbf16, #tpu.memory_space<vmem>>, vector<1x32x16xbf16>
    %53 = vector.shape_cast %52 : vector<1x32x16xbf16> to vector<32x16xbf16>
    %cst_45 = arith.constant dense<0.000000e+00> : vector<8x16xf32>
    %54 = tpu.matmul %51, %53, %cst_45 {dimension_numbers = #tpu.dot_dimension_numbers<[1], [0], [0], [1], [0, 0, 1, 1], [], []>} : vector<8x32xbf16>, vector<32x16xbf16>, vector<8x16xf32> -> vector<8x16xf32>
    %c2_46 = arith.constant 2 : index
    %c0_47 = arith.constant 0 : index
    %c0_48 = arith.constant 0 : index
    %55 = vector.load %arg4[%c2_46, %c0_47, %c0_48] : memref<3x1x16xf32, #tpu.memory_space<vmem>>, vector<1x1x16xf32>
    %56 = vector.shape_cast %55 : vector<1x1x16xf32> to vector<1x16xf32>
    %57 = vector.broadcast %56 : vector<1x16xf32> to vector<8x16xf32>
    %58 = arith.addf %54, %57 : vector<8x16xf32>
    %c2_49 = arith.constant 2 : index
    %c0_50 = arith.constant 0 : index
    %c0_51 = arith.constant 0 : index
    %59 = vector.load %arg5[%c2_49, %c0_50, %c0_51] : memref<3x8x16xf32, #tpu.memory_space<vmem>>, vector<1x8x16xf32>
    %60 = vector.shape_cast %59 : vector<1x8x16xf32> to vector<8x16xf32>
    %61 = vector.shape_cast %58 : vector<8x16xf32> to vector<1x8x16xf32>
    tpu.vector_store %arg5[%c2_49, %c0_50, %c0_51], %61 {strides = array<i32>} : memref<3x8x16xf32, #tpu.memory_space<vmem>>, vector<1x8x16xf32>,
    return
  }
}

</mosaic_0001>

<bundles_post_ra>
// kernel: multi_model_forward.1
= control target key start
LH: loop header
LB: loop body
LE: loop exit
PB: predicated region body
PF: predicated region fallthrough
CT: control target
= control target key end

     0   :  { %v600_v1 = vmov 0.0   ;;  %vm601_vm0 = vmmov 0   ;;  %vm47_vm1 = vcmask 261120   ;;  %s728_s0 = inlined_call_operand.vmem [shape: f32[8,32], index: 0, kind: input, shape index: {}]   ;;  %s729_s1 = inlined_call_operand.vmem [shape: bf16[3,32,32], index: 1, kind: input, shape index: {}]   ;;  %s730_s2 = inlined_call_operand.vmem [shape: f32[3,1,32], index: 2, kind: input, shape index: {}]   ;;  %s731_s3 = inlined_call_operand.vmem [shape: bf16[3,32,16], index: 3, kind: input, shape index: {}]   ;;  %s732_s4 = inlined_call_operand.vmem [shape: f32[3,1,16], index: 4, kind: input, shape index: {}]   ;;  %s733_s5 = inlined_call_operand.hbm [shape: f32[3,8,16], index: 5, kind: output, shape index: {}]  }
   0x1   :  { %v566_v0 = vld [vmem:[%s729_s1 + $0x8] sm:$0xff]   ;;  %513 = vmatprep.subr.bf16.mxu0 %v600_v1  ;;  %v567_v2 = vld [vmem:[%s729_s1] sm:$0xff]   ;;  %521 = vmatprep.subr.bf16.mxu1 %v600_v1  ;;  %v568_v5 = vld [vmem:[%s729_s1 + $0x18] sm:$0xff]  }
   0x2   :  { %514 = vmatpush3.bf16.msra.mxu0 %v566_v0  ;;  %517 = vmatprep.mubr.msk.bf16.mxu0 %vm601_vm0, %v600_v1  ;;  %v22_v3 = vld [vmem:[%s728_s0] sm:$0xff]  ;;  %v569_v6 = vld [vmem:[%s729_s1 + $0x10] sm:$0xff]  }
   0x3   :  { %515 = vmatprep.subr.bf16.mxu0 %v600_v1  ;;  %525 = vmatprep.mubr.msk.bf16.mxu1 %vm601_vm0, %v600_v1  ;;  %v23_v4 = vpack.c.bf16 %v22_v3, %v22_v3 }
   0x6   :  { %516 = vmatpush3.bf16.msra.mxu0 %v567_v2 }
   0x7   :  { %529 = vmatprep.subr.bf16.mxu0 %v600_v1 }
   0x9   :  { %518 = vmatmul.mubr.msk.bf16.vlgmr.msra.gmra.mxu0 %vm47_vm1, %v23_v4 }
   0xa   :  { %530 = vmatpush3.bf16.msra.mxu0 %v568_v5  ;;  %533 = vmatprep.mubr.msk.bf16.mxu0 %vm601_vm0, %v600_v1 }
   0xb   :  { %10 = vsyncpa [#allocation3], 0  ;;  %531 = vmatprep.subr.bf16.mxu0 %v600_v1  ;;  %v570_v7 = vld [vmem:[%s729_s1 + $0x28] sm:$0xff]   ;;  %v571_v8 = vld [vmem:[%s729_s1 + $0x20] sm:$0xff]   ;;  %vm159_vm2 = vcmask 130048   ;;  %s602_s25 = smov [#allocation2]  }
   0xc   :  { %v572_v9 = vld [vmem:[%s731_s3 + $0x8] sm:$0xff]   ;;  %v573_v10 = vld [vmem:[%s731_s3] sm:$0xff]   ;;  %v574_v17 = vld [vmem:[%s731_s3 + $0x18] sm:$0xff]   ;;  %s440_s26 = sshll.u32 %s602_s25, 4  ;;  %s441_s26 = int_to_ptr.vmem [resolvable:$true] %s440_s26 }
   0xd   :  { %522 = vmatpush3.bf16.msra.mxu1 %v572_v9  ;;  %v451_v11 = vld [vmem:[%s730_s2] ss:$0 sm:$0xff]  ;;  %v464_v20 = vld [vmem:[%s730_s2 + $0x1] ss:$0 sm:$0xff]  ;;  %v575_v22 = vld [vmem:[%s731_s3 + $0x10] sm:$0xff]   ;;  %s578_s28 = scalar_lea.vmem %s441_s26, 384  ;;  %p583_p1 = scmp.lt.s32.totalorder %s441_s26, %s441_s26 }
   0xe   :  { %532 = vmatpush3.bf16.msra.mxu0 %v569_v6  ;;  %523 = vmatprep.subr.bf16.mxu1 %v600_v1  ;;  %v576_v27 = vld [vmem:[%s731_s3 + $0x28] sm:$0xff]   ;;  %v482_v30 = vld [vmem:[%s730_s2 + $0x2] ss:$0 sm:$0xff]  ;;  %v455_v39 = vld [vmem:[%s732_s4] ss:$0 sm:$0xff]  ;;  %p579_p0 = scmp.ne.s32.totalorder %s441_s26, %s578_s28  ;;  %p584_p2 = scmp.lt.s32.totalorder %s578_s28, %s578_s28 }
   0xf   :  { %545 = vmatprep.subr.bf16.mxu0 %v600_v1  ;;  %v577_v32 = vld [vmem:[%s731_s3 + $0x20] sm:$0xff]  }
  0x10   :  { %v473_v45 = vld [vmem:[%s732_s4 + $0x1] ss:$0 sm:$0xff]  ;;  %v491_v51 = vld [vmem:[%s732_s4 + $0x2] ss:$0 sm:$0xff]  ;;  %p585_p3 = por %p584_p2, %p583_p1 }
  0x11   :  { %534 = vmatmul.mubr.msk.bf16.vlgmr.msra.gmra.mxu0 %vm47_vm1, %v23_v4  ;;  %524 = vmatpush3.bf16.msra.mxu1 %v573_v10 }
  0x12   :  { %546 = vmatpush3.bf16.msra.mxu0 %v570_v7  ;;  %549 = vmatprep.mubr.msk.bf16.mxu0 %vm601_vm0, %v600_v1  ;;  %p586_p4 = pnand %p585_p3, %p579_p0 }
  0x13   :  { %547 = vmatprep.subr.bf16.mxu0 %v600_v1  ;;  %537 = vmatprep.subr.bf16.mxu1 %v600_v1 }
  0x16   :  { %548 = vmatpush3.bf16.msra.mxu0 %v571_v8 }
  0x19   :  { %550 = vmatmul.mubr.msk.bf16.vlgmr.msra.gmra.mxu0 %vm47_vm1, %v23_v4 }
  0xc9   :  { %v85_v12 = vpop.f32.mrf.mxu0 }
  0xca   :  { %v86_v13 = vadd.f32 %v451_v11, %v85_v12 }
  0xcb   :  { %v519_v14 = vpop.f32.mrf.mxu0 }
  0xcc   :  { %v91_v15 = vmax.f32 %v86_v13, 0.0 }
  0xcd   :  { %v88_v16 = vpop.f32.mrf.mxu0 }
  0xce   :  { %v92_v18 = vpack.c.bf16 %v91_v15, %v91_v15 }
  0xcf   :  { %v520_v19 = vpop.f32.mrf.mxu0 }
  0xd0   :  { %526 = vmatmul.mubr.msk.bf16.vlgmr.msra.gmra.mxu1 %vm47_vm1, %v92_v18 }
  0xd1   :  { %v220_v21 = vpop.f32.mrf.mxu0  ;;  %538 = vmatpush3.bf16.msra.mxu1 %v574_v17  ;;  %541 = vmatprep.mubr.msk.bf16.mxu1 %vm601_vm0, %v600_v1 }
  0xd2   :  { %v221_v23 = vadd.f32 %v464_v20, %v220_v21  ;;  %539 = vmatprep.subr.bf16.mxu1 %v600_v1 }
  0xd3   :  { %v535_v24 = vpop.f32.mrf.mxu0 }
  0xd4   :  { %v226_v25 = vmax.f32 %v221_v23, 0.0 }
  0xd5   :  { %v223_v26 = vpop.f32.mrf.mxu0  ;;  %540 = vmatpush3.bf16.msra.mxu1 %v575_v22 }
  0xd6   :  { %v227_v28 = vpack.c.bf16 %v226_v25, %v226_v25  ;;  %553 = vmatprep.subr.bf16.mxu1 %v600_v1 }
  0xd7   :  { %v536_v29 = vpop.f32.mrf.mxu0 }
  0xd8   :  { %542 = vmatmul.mubr.msk.bf16.vlgmr.msra.gmra.mxu1 %vm47_vm1, %v227_v28 }
  0xd9   :  { %v357_v31 = vpop.f32.mrf.mxu0  ;;  %554 = vmatpush3.bf16.msra.mxu1 %v576_v27  ;;  %557 = vmatprep.mubr.msk.bf16.mxu1 %vm601_vm0, %v600_v1 }
  0xda   :  { %v358_v33 = vadd.f32 %v482_v30, %v357_v31  ;;  %555 = vmatprep.subr.bf16.mxu1 %v600_v1 }
  0xdb   :  { %v551_v34 = vpop.f32.mrf.mxu0 }
  0xdc   :  { %v363_v35 = vmax.f32 %v358_v33, 0.0 }
  0xdd   :  { %v360_v36 = vpop.f32.mrf.mxu0  ;;  %556 = vmatpush3.bf16.msra.mxu1 %v577_v32 }
  0xde   :  { %v364_v37 = vpack.c.bf16 %v363_v35, %v363_v35 }
  0xdf   :  { %v552_v38 = vpop.f32.mrf.mxu0 }
  0xe0   :  { %558 = vmatmul.mubr.msk.bf16.vlgmr.msra.gmra.mxu1 %vm47_vm1, %v364_v37 }
 0x190   :  { %v153_v40 = vpop.f32.mrf.mxu1 }
 0x191   :  { %v154_v41 = vadd.f32 %v455_v39, %v153_v40 }
 0x192   :  { %v527_v42 = vpop.f32.mrf.mxu1 }
 0x193   :  { %160 = vst.msk [vmem:[#allocation2] sm:$0xff] %vm159_vm2, %v154_v41 }
 0x194   :  { %v156_v43 = vpop.f32.mrf.mxu1 }
 0x196   :  { %v528_v44 = vpop.f32.mrf.mxu1 }
 0x198   :  { %v290_v46 = vpop.f32.mrf.mxu1 }
 0x199   :  { %v291_v47 = vadd.f32 %v473_v45, %v290_v46 }
 0x19a   :  { %v543_v48 = vpop.f32.mrf.mxu1 }
 0x19b   :  { %297 = vst.msk [vmem:[#allocation2 + $0x8] sm:$0xff] %vm159_vm2, %v291_v47 }
 0x19c   :  { %v293_v49 = vpop.f32.mrf.mxu1 }
 0x19e   :  { %v544_v50 = vpop.f32.mrf.mxu1 }
 0x1a0   :  { %v427_v52 = vpop.f32.mrf.mxu1 }
 0x1a1   :  { %v428_v53 = vadd.f32 %v491_v51, %v427_v52 }
 0x1a2   :  { %v559_v54 = vpop.f32.mrf.mxu1 }
 0x1a3   :  { %434 = vst.msk [vmem:[#allocation2 + $0x10] sm:$0xff] %vm159_vm2, %v428_v53 }
 0x1a4   :  { %v430_v55 = vpop.f32.mrf.mxu1 }
 0x1a5   :  { %589 = shalt.err (!%p586_p4)
}
 0x1a6   :  { %s603_s29 = smov 128   ;;  %s604_s30 = smov 8   ;;  %v560_v56 = vpop.f32.mrf.mxu1 }
 0x1a7   :  { %446 = dma.vmem_to_hbm [thread:$0]  %s441_s26, 384, %s733_s5, [#allocation3], %s603_s29, %s603_s29, %s604_s30  }
 0x1a8   :  { %598 = dma.done.wait [#allocation3], 384  }
 0x1a9   :  { %599 = vsyncadd [#allocation3], 4294966912 }
 0x1aa   :  { %450 = vsyncpa [#allocation3], 1 }

</bundles_post_ra>
